<compile_context>
chip_gen: v6e
topology: v6e:2x2x1
jax: 0.10.0
libtpu: 0.0.40
codegen_flags: <defaults>
</compile_context>

<pallas_src>
import math

import jax
import jax.numpy as jnp
import numpy as np
from jax.experimental import pallas as pl
from jax.experimental.pallas import tpu as pltpu


# ----------------------------------------------------------------------------
# Parameter init (deterministic, mirrors torch init_nd_freqs)
# ----------------------------------------------------------------------------
def init_nd_freqs(position_dim: int, head_dim: int, num_heads: int,
                  theta: float = 10.0, rotate: bool = True,
                  key: jax.Array | None = None) -> jax.Array:
    """Returns freqs of shape (num_heads, head_dim // 2, position_dim)."""
    if rotate and key is None:
        key = jax.random.PRNGKey(0)  # fix latent bug: rotate=True with key=None
    mag = 1.0 / theta ** (jnp.arange(0, head_dim, 4, dtype=jnp.float32) / head_dim)
    pi = math.pi
    freqs = [[] for _ in range(position_dim)]
    keys = jax.random.split(key, num_heads) if key is not None else [None] * num_heads
    for h in range(num_heads):
        if rotate:
            angles = jax.random.uniform(keys[h], (1,), dtype=jnp.float32) * 2.0 * pi
        else:
            angles = jnp.zeros((1,), dtype=jnp.float32)
        for i in range(position_dim):
            f = jnp.concatenate(
                [mag * jnp.cos(angles + pi * (2 * i) / (2 * position_dim)),
                 mag * jnp.cos(angles + pi * (2 * i + 1) / (2 * position_dim))],
                axis=-1,
            )
            freqs[i].append(f)
    freqs = [jnp.stack(dim_freqs, axis=0) for dim_freqs in freqs]
    return jnp.stack(freqs, axis=-1)  # (num_heads, head_dim//2, position_dim)


# ----------------------------------------------------------------------------
# Tile / VMEM sizing helpers
# ----------------------------------------------------------------------------
def _round_up(x: int, m: int) -> int:
    return ((x + m - 1) // m) * m


def _sublane(dtype) -> int:
    itemsize = np.dtype(dtype).itemsize
    return 8 if itemsize >= 4 else (16 if itemsize == 2 else 32)


def _vmem_config():
    """Generation-aware (tile VMEM budget, vmem_limit_bytes)."""
    phys = None
    try:
        phys = int(pltpu.get_tpu_info().vmem_capacity_bytes)
    except Exception:
        phys = None
    if phys is None:
        try:
            kind = jax.devices()[0].device_kind.lower()
            phys = (64 << 20) if "7" in kind else (128 << 20)
        except Exception:
            phys = 64 << 20  # conservative (v7x-sized)
    if phys >= (96 << 20):           # v5e / v6e: 128 MiB physical VMEM
        return 48 << 20, 96 << 20
    return 24 << 20, 48 << 20        # v7x: 64 MiB per TensorCore


def _choose_tile(n_rows: int, d_model: int, pos_dim: int, n_act_streams: int,
                 dtype, vmem_budget: int, max_tile: int | None = None) -> int:
    """Row tile: big enough to amortize per-step overhead (~0.35 us), small
    enough that the double-buffered DMA footprint fits the VMEM budget, and
    (when rows permit) small enough to keep >= 4 grid steps for megacore."""
    itemsize = np.dtype(dtype).itemsize
    sub = _sublane(dtype)
    if n_rows <= sub:
        return max(n_rows, 1)  # full-extent block (allowed even if < sublane)
    # Target ~4 MiB per activation stream per grid step.
    requested = max(512, (4 << 20) // max(d_model * itemsize, 1))
    # Double-buffered footprint of all tiled streams (activations + positions).
    bytes_per_row = 2 * (n_act_streams * d_model * itemsize + pos_dim * 4)
    cap = max(sub, (vmem_budget // max(bytes_per_row, 1)) // sub * sub)
    tile = min(requested, cap)
    # Keep >= 4 grid steps (2 per TensorCore on v7x) when rows permit.
    if n_rows >= 4 * sub:
        tile = min(tile, max(sub, (n_rows // 4) // sub * sub))
    if max_tile is not None:
        tile = min(tile, max(sub, (max_tile // sub) * sub))
    tile = max(sub, (tile // sub) * sub)
    tile = min(tile, _round_up(n_rows, sub))
    return tile


# ----------------------------------------------------------------------------
# In-kernel math.
#
# fr_ref is (P, D) with D = d_model, where column 2j holds -freqs[j] and column
# 2j+1 holds +freqs[j] (sign folded into the frequency).  Then
#   c = cos(pos @ fr)  -> cos(phi_j) duplicated on both lanes of pair j
#   s = sin(pos @ fr)  -> (-sin(phi_j), +sin(phi_j)) on the pair's lanes
# and the complex rotation of the interleaved activation is
#   out = x * c + swap_pairs(x) * s
# with swap_pairs([r, i, ...]) = [i, r, ...], built from two XLU rolls + a
# lane-parity select (wrapped lanes are never selected).
# ----------------------------------------------------------------------------
def _rot_terms(pos_ref, fr_ref):
    pos = pos_ref[...].astype(jnp.float32)      # (T, P)
    fr = fr_ref[...]                            # (P, D), f32, sign-folded
    P = fr.shape[0]
    # phi via P unrolled broadcast FMAs (P is tiny: 2-3) — stays on the VPU.
    phi = pos[:, 0:1] * fr[0:1, :]
    for p in range(1, P):
        phi = phi + pos[:, p:p + 1] * fr[p:p + 1, :]
    return jnp.cos(phi), jnp.sin(phi)           # each (T, D)


def _parity_mask(d):
    # (1, D) lane-parity mask; broadcast over sublanes inside the select.
    return (jax.lax.broadcasted_iota(jnp.int32, (1, d), 1) % 2) == 0


def _apply_rot(x_ref, o_ref, c, s, parity_even):
    x = x_ref[...].astype(jnp.float32)          # (T, D) interleaved pairs
    D = x.shape[-1]
    x_swap = jnp.where(parity_even,
                       pltpu.roll(x, D - 1, axis=1),    # lane c -> x[c+1]
                       pltpu.roll(x, 1, axis=1))        # lane c -> x[c-1]
    o_ref[...] = (x * c + x_swap * s).astype(o_ref.dtype)


def _rope_shared_kernel(pos_ref, q_ref, k_ref, fr_ref, qo_ref, ko_ref):
    c, s = _rot_terms(pos_ref, fr_ref)
    pe = _parity_mask(c.shape[-1])
    _apply_rot(q_ref, qo_ref, c, s, pe)
    _apply_rot(k_ref, ko_ref, c, s, pe)


def _rope_single_kernel(pos_ref, x_ref, fr_ref, o_ref):
    c, s = _rot_terms(pos_ref, fr_ref)
    pe = _parity_mask(c.shape[-1])
    _apply_rot(x_ref, o_ref, c, s, pe)


# ----------------------------------------------------------------------------
# pallas_call wrappers
# ----------------------------------------------------------------------------
def _compiler_params(vmem_limit):
    return pltpu.CompilerParams(
        dimension_semantics=("parallel",),
        vmem_limit_bytes=int(vmem_limit),
    )


def _rope_call_shared(pos, q, k, fr_signed, tile, *, vmem_limit, donate=False):
    N, P = pos.shape
    D = q.shape[-1]
    itemsize = np.dtype(q.dtype).itemsize
    cost = pl.CostEstimate(
        flops=int(N * D * (2 * P + 6)),
        transcendentals=int(2 * N * D),
        bytes_accessed=int(N * (4 * P + 4 * D * itemsize) + P * D * 4),
    )
    kwargs = {}
    if donate:
        kwargs["input_output_aliases"] = {1: 0, 2: 1}
    return pl.pallas_call(
        _rope_shared_kernel,
        out_shape=(jax.ShapeDtypeStruct((N, D), q.dtype),
                   jax.ShapeDtypeStruct((N, D), k.dtype)),
        grid_spec=pltpu.PrefetchScalarGridSpec(
            num_scalar_prefetch=0,
            grid=(pl.cdiv(N, tile),),
            in_specs=[
                pl.BlockSpec((tile, P), lambda i: (i, 0)),
                pl.BlockSpec((tile, D), lambda i: (i, 0)),
                pl.BlockSpec((tile, D), lambda i: (i, 0)),
                pl.BlockSpec((P, D), lambda i: (0, 0)),
            ],
            out_specs=[
                pl.BlockSpec((tile, D), lambda i: (i, 0)),
                pl.BlockSpec((tile, D), lambda i: (i, 0)),
            ],
        ),
        compiler_params=_compiler_params(vmem_limit),
        cost_estimate=cost,
        **kwargs,
    )(pos, q, k, fr_signed)


def _rope_call_single(pos, x, fr_signed, tile, *, vmem_limit, donate=False):
    N, P = pos.shape
    D = x.shape[-1]
    itemsize = np.dtype(x.dtype).itemsize
    cost = pl.CostEstimate(
        flops=int(N * D * (2 * P + 3)),
        transcendentals=int(2 * N * D),
        bytes_accessed=int(N * (4 * P + 2 * D * itemsize) + P * D * 4),
    )
    kwargs = {}
    if donate:
        kwargs["input_output_aliases"] = {1: 0}
    return pl.pallas_call(
        _rope_single_kernel,
        out_shape=jax.ShapeDtypeStruct((N, D), x.dtype),
        grid_spec=pltpu.PrefetchScalarGridSpec(
            num_scalar_prefetch=0,
            grid=(pl.cdiv(N, tile),),
            in_specs=[
                pl.BlockSpec((tile, P), lambda i: (i, 0)),
                pl.BlockSpec((tile, D), lambda i: (i, 0)),
                pl.BlockSpec((P, D), lambda i: (0, 0)),
            ],
            out_specs=pl.BlockSpec((tile, D), lambda i: (i, 0)),
        ),
        compiler_params=_compiler_params(vmem_limit),
        cost_estimate=cost,
        **kwargs,
    )(pos, x, fr_signed)


# ----------------------------------------------------------------------------
# Module-equivalent wrapper
# ----------------------------------------------------------------------------
class RoPEEncodingND:
    def __init__(self, position_dim: int, d_model: int, n_heads: int,
                 rope_base_theta: float = 10.0, key: jax.Array | None = None):
        assert d_model % n_heads == 0
        self.head_dim = d_model // n_heads
        assert self.head_dim % 2 == 0
        self.pos_dim = position_dim
        self.d_model = d_model
        self.n_heads = n_heads
        self._base_theta = rope_base_theta
        freqs = init_nd_freqs(position_dim, self.head_dim, n_heads,
                              rope_base_theta, rotate=True, key=key)
        assert freqs.shape == (n_heads, self.head_dim // 2, position_dim)
        self.freqs = freqs  # parameter, shape (H, head_dim//2, P)

        # Kernel-side frequency table: (P, d_model), each per-pair frequency
        # duplicated onto its two interleaved lanes, sign-folded as (-f, +f).
        K = n_heads * (self.head_dim // 2)
        fr_t = freqs.reshape(K, position_dim).T.astype(jnp.float32)   # (P, K)
        fr_dup = jnp.repeat(fr_t, 2, axis=-1)                         # (P, 2K)
        signs = jnp.tile(jnp.array([-1.0, 1.0], jnp.float32), (K,))   # (2K,)
        self._fr_signed = fr_dup * signs                               # (P, D)

        self._vmem_budget, self._vmem_limit = _vmem_config()

    def _shape_check(self, x, x_pos):
        assert x.ndim == x_pos.ndim
        assert x.shape[-1] == self.d_model
        assert x_pos.shape[-1] == self.pos_dim
        assert x.shape[:-1] == x_pos.shape[:-1]

    # TODO(synk): the torch module's "normalized coordinates" warning is a
    # host-side data-dependent check; skipped here (no device->host sync).
    def __call__(self, query, query_pos, key, key_pos=None, *,
                 donate_inputs: bool = False, max_tile: int | None = None):
        self._shape_check(query, query_pos)
        lead_q = query.shape[:-1]
        Nq = int(np.prod(lead_q)) if lead_q else 1
        D = self.d_model
        q2 = query.reshape(Nq, D)
        qpos = query_pos.reshape(Nq, self.pos_dim).astype(jnp.float32)

        if key_pos is None:
            # Shared positions: fused kernel computes cos/sin once for q and k.
            assert key.shape == query.shape
            k2 = key.reshape(Nq, D)
            tile = _choose_tile(Nq, D, self.pos_dim, 4, query.dtype,
                                self._vmem_budget, max_tile)
            qo, ko = _rope_call_shared(qpos, q2, k2, self._fr_signed, tile,
                                       vmem_limit=self._vmem_limit,
                                       donate=donate_inputs)
            lead_k = lead_q
        else:
            self._shape_check(key, key_pos)
            lead_k = key.shape[:-1]
            Nk = int(np.prod(lead_k)) if lead_k else 1
            k2 = key.reshape(Nk, D)
            kpos = key_pos.reshape(Nk, self.pos_dim).astype(jnp.float32)
            tile_q = _choose_tile(Nq, D, self.pos_dim, 2, query.dtype,
                                  self._vmem_budget, max_tile)
            tile_k = _choose_tile(Nk, D, self.pos_dim, 2, key.dtype,
                                  self._vmem_budget, max_tile)
            qo = _rope_call_single(qpos, q2, self._fr_signed, tile_q,
                                   vmem_limit=self._vmem_limit, donate=donate_inputs)
            ko = _rope_call_single(kpos, k2, self._fr_signed, tile_k,
                                   vmem_limit=self._vmem_limit, donate=donate_inputs)

        # NOTE: matches the torch output contract; may force an XLA relayout
        # when head_dim < 128 — consumers that accept (..., d_model) should
        # fold this split into their own op.
        qo = qo.reshape(lead_q + (self.n_heads, self.head_dim))
        ko = ko.reshape(lead_k + (self.n_heads, self.head_dim))
        return qo, ko


# ----------------------------------------------------------------------------
# Pure-JAX reference (mirrors torch.polar / view_as_complex semantics)
# ----------------------------------------------------------------------------
def _reference(module: RoPEEncodingND, x, positions):
    lead = x.shape[:-1]
    N = int(np.prod(lead)) if lead else 1
    K = module.n_heads * (module.head_dim // 2)
    phi = positions.reshape(N, module.pos_dim).astype(jnp.float32) @ \
        module.freqs.reshape(K, module.pos_dim).T
    phi = phi.reshape(lead + (module.n_heads, module.head_dim // 2))
    rot = jnp.cos(phi) + 1j * jnp.sin(phi)
    xc = x.reshape(lead + (module.n_heads, module.head_dim // 2, 2))
    xc = xc[..., 0] + 1j * xc[..., 1]
    prod = xc * rot
    out = jnp.stack([jnp.real(prod), jnp.imag(prod)], axis=-1)
    return out.reshape(lead + (module.n_heads, module.head_dim)).astype(x.dtype)


if __name__ == "__main__":
    # small shapes: position_dim=2, d_model=128 (lane-dense), n_heads=4 (head_dim=32)
    B, S = 2, 8
    position_dim, d_model, n_heads = 2, 128, 4

    root = jax.random.PRNGKey(0)
    k_freq, k_q, k_k, k_qp, k_kp = jax.random.split(root, 5)

    module = RoPEEncodingND(position_dim, d_model, n_heads,
                            rope_base_theta=10.0, key=k_freq)

    query = jax.random.normal(k_q, (B, S, d_model), dtype=jnp.float32)
    key_t = jax.random.normal(k_k, (B, S, d_model), dtype=jnp.float32)
    # un-normalized coordinates (module expects values outside [0, 1])
    query_pos = jax.random.uniform(k_qp, (B, S, position_dim), dtype=jnp.float32) * 16.0
    key_pos = jax.random.uniform(k_kp, (B, S, position_dim), dtype=jnp.float32) * 16.0

    # Path 1: distinct key positions (two single-stream kernel calls).
    q_rot, k_rot = module(query, query_pos, key_t, key_pos)
    # Path 2: shared positions (fused q/k kernel, cos/sin computed once).
    q_rot2, k_rot2 = module(query, query_pos, key_t, None)
    jax.block_until_ready((q_rot, k_rot, q_rot2, k_rot2))

    assert q_rot.shape == (B, S, n_heads, d_model // n_heads)
    assert k_rot.shape == (B, S, n_heads, d_model // n_heads)

    q_ref = _reference(module, query, query_pos)
    k_ref = _reference(module, key_t, key_pos)
    k_ref_shared = _reference(module, key_t, query_pos)
    np.testing.assert_allclose(np.asarray(q_rot), np.asarray(q_ref), atol=1e-5, rtol=1e-5)
    np.testing.assert_allclose(np.asarray(k_rot), np.asarray(k_ref), atol=1e-5, rtol=1e-5)
    np.testing.assert_allclose(np.asarray(q_rot2), np.asarray(q_ref), atol=1e-5, rtol=1e-5)
    np.testing.assert_allclose(np.asarray(k_rot2), np.asarray(k_ref_shared), atol=1e-5, rtol=1e-5)

    # Path 3: ragged row count + forced multi-step grid -> exercises the
    # cdiv grid and the masked partial last block (no wrapper-side padding).
    N3 = 13
    k_q3, k_k3, k_p3, k_p4 = jax.random.split(jax.random.PRNGKey(1), 4)
    q3 = jax.random.normal(k_q3, (N3, d_model), dtype=jnp.float32)
    k3 = jax.random.normal(k_k3, (N3, d_model), dtype=jnp.float32)
    p3 = jax.random.uniform(k_p3, (N3, position_dim), dtype=jnp.float32) * 16.0
    p4 = jax.random.uniform(k_p4, (N3, position_dim), dtype=jnp.float32) * 16.0
    q3_rot, k3_rot = module(q3, p3, k3, p4, max_tile=8)
    q3_rot2, k3_rot2 = module(q3, p3, k3, None, max_tile=8)
    jax.block_until_ready((q3_rot, k3_rot, q3_rot2, k3_rot2))
    np.testing.assert_allclose(np.asarray(q3_rot), np.asarray(_reference(module, q3, p3)),
                               atol=1e-5, rtol=1e-5)
    np.testing.assert_allclose(np.asarray(k3_rot), np.asarray(_reference(module, k3, p4)),
                               atol=1e-5, rtol=1e-5)
    np.testing.assert_allclose(np.asarray(q3_rot2), np.asarray(_reference(module, q3, p3)),
                               atol=1e-5, rtol=1e-5)
    np.testing.assert_allclose(np.asarray(k3_rot2), np.asarray(_reference(module, k3, p3)),
                               atol=1e-5, rtol=1e-5)

    print("KERNEL_OK")
</pallas_src>

<mosaic_0001>
module attributes {stable_mosaic.version = 11 : i64} {
  func.func @_rope_single_kernel(%arg0: i32, %arg1: memref<16x2xf32, #tpu.memory_space<vmem>>, %arg2: memref<16x128xf32, #tpu.memory_space<vmem>>, %arg3: memref<2x128xf32, #tpu.memory_space<vmem>>, %arg4: memref<16x128xf32, #tpu.memory_space<vmem>>) attributes {dimension_semantics = [#tpu.dimension_semantics<parallel>], iteration_bounds = array<i64: 1>, scalar_prefetch = 0 : i64, scratch_operands = 0 : i64, tpu.core_type = #tpu.core_type<tc>, window_params = [{transform_indices = @transform_0, window_bounds = array<i64: 16, 2>}, {transform_indices = @transform_1, window_bounds = array<i64: 16, 128>}, {pipeline_mode = #tpu.pipeline_mode<synchronous>, transform_indices = @transform_2, window_bounds = array<i64: 2, 128>}, {transform_indices = @transform_3, window_bounds = array<i64: 16, 128>}]} {
    %c0 = arith.constant 0 : index
    %c0_0 = arith.constant 0 : index
    %0 = vector.load %arg1[%c0, %c0_0] : memref<16x2xf32, #tpu.memory_space<vmem>>, vector<16x2xf32>
    %c0_1 = arith.constant 0 : index
    %c0_2 = arith.constant 0 : index
    %1 = vector.load %arg3[%c0_1, %c0_2] : memref<2x128xf32, #tpu.memory_space<vmem>>, vector<2x128xf32>
    %2 = vector.extract_strided_slice %0 {offsets = [0, 0], sizes = [16, 1], strides = [1, 1]} : vector<16x2xf32> to vector<16x1xf32>
    %3 = vector.extract_strided_slice %1 {offsets = [0, 0], sizes = [1, 128], strides = [1, 1]} : vector<2x128xf32> to vector<1x128xf32>
    %4 = vector.broadcast %2 : vector<16x1xf32> to vector<16x128xf32>
    %5 = vector.broadcast %3 : vector<1x128xf32> to vector<16x128xf32>
    %6 = arith.mulf %4, %5 : vector<16x128xf32>
    %7 = vector.extract_strided_slice %0 {offsets = [0, 1], sizes = [16, 1], strides = [1, 1]} : vector<16x2xf32> to vector<16x1xf32>
    %8 = vector.extract_strided_slice %1 {offsets = [1, 0], sizes = [1, 128], strides = [1, 1]} : vector<2x128xf32> to vector<1x128xf32>
    %9 = vector.broadcast %7 : vector<16x1xf32> to vector<16x128xf32>
    %10 = vector.broadcast %8 : vector<1x128xf32> to vector<16x128xf32>
    %11 = arith.mulf %9, %10 : vector<16x128xf32>
    %12 = arith.addf %6, %11 : vector<16x128xf32>
    %13 = math.cos %12 : vector<16x128xf32>
    %14 = math.sin %12 : vector<16x128xf32>
    %15 = tpu.iota {dimensions = array<i32: 1>} : vector<1x128xi32>
    %c2_i32 = arith.constant 2 : i32
    %c0_i32 = arith.constant 0 : i32
    %16 = arith.cmpi eq, %c2_i32, %c0_i32 : i32
    %c1_i32 = arith.constant 1 : i32
    %17 = arith.select %16, %c1_i32, %c2_i32 : i32
    %18 = vector.broadcast %17 : i32 to vector<1x128xi32>
    %19 = arith.remsi %15, %18 : vector<1x128xi32>
    %c0_i32_3 = arith.constant 0 : i32
    %20 = vector.broadcast %c0_i32_3 : i32 to vector<1x128xi32>
    %21 = arith.cmpi ne, %19, %20 : vector<1x128xi32>
    %c0_i32_4 = arith.constant 0 : i32
    %22 = vector.broadcast %c0_i32_4 : i32 to vector<1x128xi32>
    %23 = arith.cmpi slt, %19, %22 : vector<1x128xi32>
    %c0_i32_5 = arith.constant 0 : i32
    %24 = arith.cmpi slt, %17, %c0_i32_5 : i32
    %25 = vector.broadcast %24 : i1 to vector<1x128xi1>
    %26 = vector.broadcast %25 : vector<1x128xi1> to vector<1x128xi1>
    %27 = arith.xori %23, %26 : vector<1x128xi1>
    %28 = arith.andi %27, %21 : vector<1x128xi1>
    %29 = vector.broadcast %17 : i32 to vector<1x128xi32>
    %30 = arith.addi %19, %29 : vector<1x128xi32>
    %31 = arith.select %28, %30, %19 : vector<1x128xi1>, vector<1x128xi32>
    %c0_i32_6 = arith.constant 0 : i32
    %32 = vector.broadcast %c0_i32_6 : i32 to vector<1x128xi32>
    %33 = arith.cmpi eq, %31, %32 : vector<1x128xi32>
    %c0_7 = arith.constant 0 : index
    %c0_8 = arith.constant 0 : index
    %34 = vector.load %arg2[%c0_7, %c0_8] : memref<16x128xf32, #tpu.memory_space<vmem>>, vector<16x128xf32>
    %c127_i32 = arith.constant 127 : i32
    %35 = tpu.dynamic_rotate %34 by %c127_i32 dim 1 : vector<16x128xf32>, i32 -> vector<16x128xf32>
    %c1_i32_9 = arith.constant 1 : i32
    %36 = tpu.dynamic_rotate %34 by %c1_i32_9 dim 1 : vector<16x128xf32>, i32 -> vector<16x128xf32>
    %37 = vector.shape_cast %33 : vector<1x128xi1> to vector<1x128xi1>
    %38 = vector.broadcast %37 : vector<1x128xi1> to vector<16x128xi1>
    %39 = arith.select %38, %35, %36 : vector<16x128xi1>, vector<16x128xf32>
    %40 = arith.mulf %34, %13 : vector<16x128xf32>
    %41 = arith.mulf %39, %14 : vector<16x128xf32>
    %42 = arith.addf %40, %41 : vector<16x128xf32>
    %c0_10 = arith.constant 0 : index
    %c0_11 = arith.constant 0 : index
    %43 = vector.load %arg4[%c0_10, %c0_11] : memref<16x128xf32, #tpu.memory_space<vmem>>, vector<16x128xf32>
    tpu.vector_store %arg4[%c0_10, %c0_11], %42 {strides = array<i32>} : memref<16x128xf32, #tpu.memory_space<vmem>>, vector<16x128xf32>,
    return
  }
  func.func @transform_0(%arg0: i32) -> (i32, i32) {
    %c0_i32 = arith.constant 0 : i32
    %c0_i32_0 = arith.constant 0 : i32
    return %arg0, %c0_i32 : i32, i32
  }
  func.func @transform_1(%arg0: i32) -> (i32, i32) {
    %c0_i32 = arith.constant 0 : i32
    %c0_i32_0 = arith.constant 0 : i32
    return %arg0, %c0_i32 : i32, i32
  }
  func.func @transform_2(%arg0: i32) -> (i32, i32) {
    %c0_i32 = arith.constant 0 : i32
    %c0_i32_0 = arith.constant 0 : i32
    %c0_i32_1 = arith.constant 0 : i32
    return %c0_i32, %c0_i32_0 : i32, i32
  }
  func.func @transform_3(%arg0: i32) -> (i32, i32) {
    %c0_i32 = arith.constant 0 : i32
    %c0_i32_0 = arith.constant 0 : i32
    return %arg0, %c0_i32 : i32, i32
  }
}

</mosaic_0001>

<bundles_post_ra>
// kernel: tpu_custom_call.1
= control target key start
LH: loop header
LB: loop body
LE: loop exit
PB: predicated region body
PF: predicated region fallthrough
CT: control target
= control target key end

     0   :  { %v587_v1 = vmov 1   ;;  %v588_v2 = vmov 0   ;;  %s718_s0 = inlined_call_operand.vmem [shape: f32[16,2], index: 0, kind: input, shape index: {}]   ;;  %s719_s1 = inlined_call_operand.vmem [shape: f32[16,128], index: 1, kind: input, shape index: {}]   ;;  %s720_s2 = inlined_call_operand.vmem [shape: f32[2,128], index: 2, kind: input, shape index: {}]   ;;  %s721_s3 = inlined_call_operand.hbm [shape: f32[16,128], index: 3, kind: output, shape index: {}]  }
   0x1   :  { %v15_v0 = vld [vmem:[%s718_s0] sm:$0xff]  ;;  %555 = vset.pattern.permute.xlu1 %v587_v1  ;;  %554 = vset.pattern.permute.xlu0 %v588_v2  ;;  %v16_v3 = vld [vmem:[%s718_s0 + $0x8] sm:$0xff] }
   0x2   :  { %35 = vperm.xlu1 %555, %v15_v0   ;;  %20 = vperm.xlu0 %554, %v15_v0  }
   0x3   :  { %8 = vsyncpa [#allocation3], 0  ;;  %v629_v4 = vld [vmem:[%s719_s1 + $0x8] sm:$0xff]  ;;  %v634_v5 = vld [vmem:[%s719_s1] sm:$0xff]  ;;  %s589_s20 = smov 127   ;;  %s590_s0 = smov 1   ;;  %v28_v6 = vlaneseq }
   0x4   :  { %v17_v10 = vld [vmem:[%s720_s2] sm:$0x3]  ;;  %v591_v39 = vmov 683565275   ;;  %v592_v43 = vmov 2475754826  }
   0x5   :  { %v29_v7 = vshrl.u32 %v28_v6, 7  ;;  %v593_v45 = vmov 2131351028   ;;  %v594_v47 = vmov 2102212464   ;;  %s597_s1 = smov [#allocation2]  }
   0x6   :  { %39 = vperm.xlu1 %555, %v16_v3   ;;  %25 = vperm.xlu0 %554, %v16_v3   ;;  %v595_v49 = vmov 920167782   ;;  %v596_v56 = vmov 1326507024   ;;  %s506_s2 = sshll.u32 %s597_s1, 4  ;;  %s507_s2 = int_to_ptr.vmem [resolvable:$true] %s506_s2 }
   0x7   :  { %v44_v8 = vsub.s32 1, %v29_v7  ;;  %v30_v9 = vsub.s32 0, %v29_v7  ;;  %s565_s23 = scalar_lea.vmem %s507_s2, 256  ;;  %p570_p1 = scmp.lt.s32.totalorder %s507_s2, %s507_s2 }
   0x8   :  { %p566_p0 = scmp.ne.s32.totalorder %s507_s2, %s565_s23  ;;  %p571_p2 = scmp.lt.s32.totalorder %s565_s23, %s565_s23 }
   0x9   :  { %v45_v11 = vrot.slane %v17_v10, %v44_v8  ;;  %v31_v12 = vrot.slane %v17_v10, %v30_v9 }
   0xa   :  { %483 = vrot.lane.b32.xlu1 %v629_v4, %s589_s20  ;;  %481 = vrot.lane.b32.xlu0 %v634_v5, %s589_s20  ;;  %p572_p3 = por %p571_p2, %p570_p1 }
   0xb   :  { %556 = vset.pattern.permute.xlu0 %v587_v1 }
   0xc   :  { %p573_p4 = pnand %p572_p3, %p566_p0 }
   0xe   :  { %487 = vrot.lane.b32.xlu1 %v629_v4, %s590_s0  ;;  %485 = vrot.lane.b32.xlu0 %v634_v5, %s590_s0 }
  0x7d   :  { %v36_v13 = vpop.permute.xlu1 %35  ;;  %v21_v14 = vpop.permute.xlu0 %20 }
  0x7e   :  { %v46_v15 = vmul.f32 %v45_v11, %v36_v13  ;;  %v32_v16 = vmul.f32 %v31_v12, %v21_v14 }
  0x80   :  { %v644_v17 = vadd.f32 %v46_v15, %v32_v16 }
  0x81   :  { %v40_v18 = vpop.permute.xlu1 %39  ;;  %v26_v19 = vpop.permute.xlu0 %25 }
  0x82   :  { %v50_v20 = vand.u32 2147483647, %v644_v17  ;;  %v53_v21 = vand.u32 2139095040, %v644_v17  ;;  %v47_v22 = vmul.f32 %v45_v11, %v40_v18  ;;  %v33_v23 = vmul.f32 %v31_v12, %v26_v19 }
  0x83   :  { %vm52_vm14 = vcmp.lt.s32.totalorder %v644_v17, 0 }
  0x84   :  { %v54_v24 = vshrl.u32 %v53_v21, 23  ;;  %v57_v25 = vand.u32 8388607, %v50_v20  ;;  %v650_v26 = vadd.f32 %v47_v22, %v33_v23  ;;  %vm51_vm15 = vcmp.le.f32.partialorder %v50_v20, 0.7853982 }
  0x86   :  { %v517_v27 = vadd.s32 4294967169, %v54_v24  ;;  %v156_v28 = vand.u32 2139095040, %v650_v26  ;;  %v58_v30 = vor.u32 8388608, %v57_v25  ;;  %v153_v32 = vand.u32 2147483647, %v650_v26 }
  0x88   :  { %v60_v29 = vadd.s32 1, %v517_v27  ;;  %v157_v31 = vshrl.u32 %v156_v28, 23  ;;  %v654_v37 = vshll.u32 %v58_v30, 8  ;;  %v160_v41 = vand.u32 8388607, %v153_v32 }
  0x8a   :  { %vm61_vm0 = vcmp.gt.s32.totalorder %v60_v29, 0  ;;  %v521_v34 = vadd.s32 4294967169, %v157_v31  ;;  %v161_v10 = vor.u32 8388608, %v160_v41 }
  0x8b   :  { %v62_v33 = vsel %vm61_vm0, %v60_v29, 0  ;;  %vm155_vm0 = vcmp.lt.s32.totalorder %v650_v26, 0 }
  0x8c   :  { %v63_v35 = vshrl.u32 %v62_v33, 5  ;;  %v64_v36 = vand.u32 31, %v62_v33  ;;  %v163_v42 = vadd.s32 1, %v521_v34  ;;  %v201_v25 = vshll.u32 %v161_v10, 8 }
  0x8e   :  { %v65_v38 = vsub.s32 32, %v64_v36  ;;  %v67_v40 = vshll.u32 %v591_v39, %v64_v36  ;;  %v70_v44 = vshll.u32 %v592_v43, %v64_v36  ;;  %v73_v46 = vshll.u32 %v593_v45, %v64_v36 }
  0x8f   :  { %v76_v48 = vshll.u32 %v594_v47, %v64_v36  ;;  %v79_v50 = vshll.u32 %v595_v49, %v64_v36  ;;  %vm82_vm1 = vcmp.lt.s32.totalorder %v63_v35, 1  ;;  %vm84_vm2 = vcmp.lt.s32.totalorder %v63_v35, 3 }
  0x90   :  { %v68_v51 = vshrl.u32 %v592_v43, %v65_v38  ;;  %v71_v52 = vshrl.u32 %v593_v45, %v65_v38  ;;  %v74_v53 = vshrl.u32 %v594_v47, %v65_v38  ;;  %v66_v54 = vshrl.u32 %v591_v39, %v65_v38 }
  0x91   :  { %v77_v55 = vshrl.u32 %v595_v49, %v65_v38  ;;  %v80_v57 = vshrl.u32 %v596_v56, %v65_v38  ;;  %vm164_vm3 = vcmp.gt.s32.totalorder %v163_v42, 0  ;;  %vm85_vm4 = vcmp.lt.s32.totalorder %v63_v35, 4 }
  0x92   :  { %v69_v58 = vor.u32 %v68_v51, %v67_v40  ;;  %v72_v59 = vor.u32 %v71_v52, %v70_v44  ;;  %v75_v60 = vor.u32 %v74_v53, %v73_v46  ;;  %v165_v63 = vsel %vm164_vm3, %v163_v42, 0 }
  0x93   :  { %v78_v61 = vor.u32 %v77_v55, %v76_v48  ;;  %v81_v62 = vor.u32 %v80_v57, %v79_v50  ;;  %vm83_vm5 = vcmp.lt.s32.totalorder %v63_v35, 2  ;;  %v167_v13 = vand.u32 31, %v165_v63 }
  0x94   :  { %v86_v0 = vsel %vm82_vm1, %v66_v54, %v69_v58  ;;  %v87_v1 = vsel %vm85_vm4, %v75_v60, 2102212464  ;;  %v90_v2 = vsel %vm82_vm1, %v69_v58, %v72_v59  ;;  %v94_v3 = vsel %vm82_vm1, %v72_v59, %v75_v60 }
  0x95   :  { %v88_v7 = vsel %vm84_vm2, %v72_v59, %v87_v1  ;;  %v91_v8 = vsel %vm85_vm4, %v78_v61, 920167782  ;;  %v95_v9 = vsel %vm85_vm4, %v81_v62, 1326507024  ;;  %v166_v23 = vshrl.u32 %v165_v63, 5 }
  0x96   :  { %v92_v11 = vsel %vm84_vm2, %v75_v60, %v91_v8  ;;  %v96_v12 = vsel %vm84_vm2, %v78_v61, %v95_v9  ;;  %v89_v14 = vsel %vm83_vm5, %v86_v0, %v88_v7  ;;  %v168_v24 = vsub.s32 32, %v167_v13 }
  0x97   :  { %v93_v15 = vsel %vm83_vm5, %v90_v2, %v92_v11  ;;  %v97_v16 = vsel %vm83_vm5, %v94_v3, %v96_v12  ;;  %v105_v27 = vmul.u32 %v654_v37, %v89_v14  ;;  %v170_v28 = vshll.u32 %v591_v39, %v167_v13 }
  0x98   :  { %v667_v18 = vmul.u32.u64.low %v654_v37, %v97_v16  ;;  %v668_v19 = vmul.u32.u64.high %v654_v37, %v97_v16, %v667_v18  ;;  %v671_v21 = vmul.u32.u64.low %v654_v37, %v93_v15  ;;  %v672_v22 = vmul.u32.u64.high %v654_v37, %v93_v15, %v671_v21 }
  0x99   :  { %v173_v29 = vshll.u32 %v592_v43, %v167_v13  ;;  %v176_v30 = vshll.u32 %v593_v45, %v167_v13  ;;  %v171_v31 = vshrl.u32 %v592_v43, %v168_v24  ;;  %v174_v33 = vshrl.u32 %v593_v45, %v168_v24 }
  0x9a   :  { %v177_v34 = vshrl.u32 %v594_v47, %v168_v24  ;;  %v179_v35 = vshll.u32 %v594_v47, %v167_v13  ;;  %vm107_vm6 = vc.u32 %v668_v19, %v671_v21  ;;  %v108_v36 = vadd.s32 1, %v672_v22 }
  0x9b   :  { %v180_v38 = vshrl.u32 %v595_v49, %v168_v24  ;;  %v182_v40 = vshll.u32 %v595_v49, %v167_v13  ;;  %v172_v41 = vor.u32 %v171_v31, %v170_v28  ;;  %v175_v42 = vor.u32 %v174_v33, %v173_v29 }
  0x9c   :  { %v178_v44 = vor.u32 %v177_v34, %v176_v30  ;;  %v183_v46 = vshrl.u32 %v596_v56, %v168_v24  ;;  %v109_v37 = vsel %vm107_vm6, %v108_v36, %v672_v22  ;;  %vm185_vm7 = vcmp.lt.s32.totalorder %v166_v23, 1 }
  0x9d   :  { %v181_v48 = vor.u32 %v180_v38, %v179_v35  ;;  %vm188_vm8 = vcmp.lt.s32.totalorder %v166_v23, 4  ;;  %v110_v43 = vadd.s32 %v109_v37, %v105_v27  ;;  %vm187_vm9 = vcmp.lt.s32.totalorder %v166_v23, 3 }
  0x9e   :  { %v184_v45 = vor.u32 %v183_v46, %v182_v40  ;;  %v190_v47 = vsel %vm188_vm8, %v178_v44, 2102212464  ;;  %v169_v50 = vshrl.u32 %v591_v39, %v168_v24  ;;  %v193_v51 = vsel %vm185_vm7, %v172_v41, %v175_v42 }
  0x9f   :  { %v194_v52 = vsel %vm188_vm8, %v181_v48, 920167782  ;;  %v197_v53 = vsel %vm185_vm7, %v175_v42, %v178_v44  ;;  %v111_v54 = vadd.s32 536870912, %v110_v43  ;;  %vm186_vm10 = vcmp.lt.s32.totalorder %v166_v23, 2 }
  0xa0   :  { %v195_v49 = vsel %vm187_vm9, %v178_v44, %v194_v52  ;;  %v198_v55 = vsel %vm188_vm8, %v184_v45, 1326507024  ;;  %v189_v57 = vsel %vm185_vm7, %v169_v50, %v172_v41  ;;  %v191_v56 = vsel %vm187_vm9, %v175_v42, %v190_v47 }
  0xa1   :  { %v196_v58 = vsel %vm186_vm10, %v193_v51, %v195_v49  ;;  %v199_v59 = vsel %vm187_vm9, %v181_v48, %v198_v55  ;;  %v112_v60 = vshrl.u32 %v111_v54, 30  ;;  %v192_v2 = vsel %vm186_vm10, %v189_v57, %v191_v56 }
  0xa2   :  { %v200_v61 = vsel %vm186_vm10, %v197_v53, %v199_v59  ;;  %v682_v62 = vmul.u32.u64.low %v201_v25, %v196_v58  ;;  %v683_v63 = vmul.u32.u64.high %v201_v25, %v196_v58, %v682_v62  ;;  %v208_v8 = vmul.u32 %v201_v25, %v192_v2 }
  0xa3   :  { %v685_v0 = vmul.u32.u64.low %v201_v25, %v200_v61  ;;  %v686_v1 = vmul.u32.u64.high %v201_v25, %v200_v61, %v685_v0  ;;  %v113_v39 = vshll.u32 %v112_v60, 30  ;;  %v106_v24 = vadd.s32 %v671_v21, %v668_v19 }
  0xa4   :  { %v211_v7 = vadd.s32 1, %v683_v63  ;;  %v136_v50 = vsub.s32 4, %v112_v60  ;;  %v465_v58 = vand.u32 127, %v28_v6  ;;  %vm154_vm1 = vcmp.le.f32.partialorder %v153_v32, 0.7853982 }
  0xa5   :  { %v114_v3 = vsub.s32 %v110_v43, %v113_v39  ;;  %vm210_vm11 = vc.u32 %v686_v1, %v682_v62  ;;  %v209_v37 = vadd.s32 %v682_v62, %v686_v1  ;;  %v482_v62 = vpop.permute.xlu0 %481  ;;  %vm142_vm9 = vweird.f32 %v644_v17 }
  0xa6   :  { %v212_v10 = vsel %vm210_vm11, %v211_v7, %v683_v63  ;;  %v137_v55 = vsel %vm52_vm14, %v136_v50, %v112_v60  ;;  %v470_v0 = vand.u32 1, %v465_v58 }
  0xa7   :  { %v116_v9 = vsub.s32 0, %v114_v3  ;;  %v213_v11 = vadd.s32 %v212_v10, %v208_v8  ;;  %v139_v59 = vsel %vm51_vm15, 0, %v137_v55 }
  0xa8   :  { %v349_v1 = vadd.s32 3, %v139_v59  ;;  %vm703_vm2 = vcmp.eq.s32.totalorder %v470_v0, 0  ;;  %v143_v6 = vand.u32 3, %v139_v59 }
  0xa9   :  { %v518_v12 = vmin.u32 %v116_v9, %v114_v3  ;;  %v214_v13 = vadd.s32 536870912, %v213_v11  ;;  %v486_v7 = vpop.permute.xlu0 %485 }
  0xaa   :  { %vm148_vm3 = vcmp.eq.s32.totalorder %v143_v6, 2  ;;  %vm145_vm5 = vcmp.eq.s32.totalorder %v143_v6, 0  ;;  %vm144_vm7 = vcmp.lt.s32.totalorder %v143_v6, 2 }
  0xab   :  { %v118_v14 = vclz %v518_v12  ;;  %v215_v15 = vshrl.u32 %v214_v13, 30  ;;  %v491_v12 = vsel %vm703_vm2, %v482_v62, %v486_v7 }
  0xad   :  { %v519_v16 = vadd.s32 4294967294, %v118_v14  ;;  %v216_v18 = vshll.u32 %v215_v15, 30  ;;  %v239_v20 = vsub.s32 4, %v215_v15 }
  0xaf   :  { %vm520_vm12 = vcmp.lt.s32.totalorder %v519_v16, 0  ;;  %v217_v23 = vsub.s32 %v213_v11, %v216_v18  ;;  %v240_v8 = vsel %vm155_vm0, %v239_v20, %v215_v15 }
  0xb0   :  { %v121_v22 = vsel %vm520_vm12, 0, %v519_v16  ;;  %v242_v13 = vsel %vm154_vm1, 0, %v240_v8 }
  0xb1   :  { %v122_v27 = vsub.s32 32, %v121_v22  ;;  %v126_v25 = vsub.s32 4294967266, %v121_v22  ;;  %v219_v28 = vsub.s32 0, %v217_v23  ;;  %v123_v29 = vshll.u32 %v114_v3, %v121_v22 }
  0xb2   :  { %v350_v3 = vand.u32 3, %v349_v1  ;;  %v453_v15 = vadd.s32 3, %v242_v13 }
  0xb3   :  { %v124_v30 = vshrl.u32 %v106_v24, %v122_v27  ;;  %v127_v31 = vadd.s32 127, %v126_v25  ;;  %v522_v33 = vmin.u32 %v219_v28, %v217_v23 }
  0xb4   :  { %vm355_vm4 = vcmp.eq.s32.totalorder %v350_v3, 2  ;;  %vm352_vm6 = vcmp.eq.s32.totalorder %v350_v3, 0  ;;  %vm351_vm8 = vcmp.lt.s32.totalorder %v350_v3, 2 }
  0xb5   :  { %v125_v34 = vor.u32 %v124_v30, %v123_v29  ;;  %v128_v35 = vshll.u32 %v127_v31, 23  ;;  %v221_v36 = vclz %v522_v33  ;;  %v484_v30 = vpop.permute.xlu1 %483  ;;  %v246_v31 = vand.u32 3, %v242_v13 }
  0xb6   :  { %v454_v33 = vand.u32 3, %v453_v15 }
  0xb7   :  { %v129_v38 = vor.u32 4788187, %v128_v35  ;;  %v523_v40 = vadd.s32 4294967294, %v221_v36  ;;  %v132_v42 = vcvt.s32.f32 %v125_v34  ;;  %vm251_vm10 = vcmp.eq.s32.totalorder %v246_v31, 2 }
  0xb8   :  { %vm459_vm11 = vcmp.eq.s32.totalorder %v454_v33, 2  ;;  %vm248_vm12 = vcmp.eq.s32.totalorder %v246_v31, 0 }
  0xb9   :  { %v130_v41 = vand.u32 2147483647, %v129_v38  ;;  %vm524_vm13 = vcmp.lt.s32.totalorder %v523_v40, 0 }
  0xba   :  { %v224_v46 = vsel %vm524_vm13, 0, %v523_v40  ;;  %vm456_vm13 = vcmp.eq.s32.totalorder %v454_v33, 0 }
  0xbb   :  { %v133_v44 = vmul.f32 %v132_v42, %v130_v41  ;;  %v225_v19 = vsub.s32 32, %v224_v46  ;;  %v229_v21 = vsub.s32 4294967266, %v224_v46  ;;  %v226_v43 = vshll.u32 %v217_v23, %v224_v46  ;;  %v488_v41 = vpop.permute.xlu1 %487 }
  0xbd   :  { %v134_v48 = vxor.u32 2147483648, %v133_v44  ;;  %v227_v45 = vshrl.u32 %v209_v37, %v225_v19  ;;  %v230_v47 = vadd.s32 127, %v229_v21 }
  0xbf   :  { %v135_v51 = vsel %vm52_vm14, %v134_v48, %v133_v44  ;;  %v228_v52 = vor.u32 %v227_v45, %v226_v43  ;;  %v231_v53 = vshll.u32 %v230_v47, 23  ;;  %vm247_vm14 = vcmp.lt.s32.totalorder %v246_v31, 2 }
  0xc0   :  { %v138_v54 = vsel %vm51_vm15, %v644_v17, %v135_v51  ;;  %vm455_vm15 = vcmp.lt.s32.totalorder %v454_v33, 2  ;;  %v492_v48 = vsel %vm703_vm2, %v484_v30, %v488_v41 }
  0xc1   :  { %557 = vcosq.f32 %v138_v54  ;;  %v232_v49 = vor.u32 4788187, %v231_v53  ;;  %v235_v56 = vcvt.s32.f32 %v228_v52 }
  0xc2   :  { %559 = vsinq.f32 %v138_v54 }
  0xc3   :  { %v233_v57 = vand.u32 2147483647, %v232_v49 }
  0xc5   :  { %v236_v61 = vmul.f32 %v235_v56, %v233_v57 }
  0xc7   :  { %v237_v63 = vxor.u32 2147483648, %v236_v61 }
  0xc9   :  { %v238_v39 = vsel %vm155_vm0, %v237_v63, %v236_v61  ;;  %vm245_vm0 = vweird.f32 %v650_v26 }
  0xca   :  { %v241_v60 = vsel %vm154_vm1, %v650_v26, %v238_v39 }
  0xcb   :  { %561 = vcosq.f32 %v241_v60 }
  0xcc   :  { %563 = vsinq.f32 %v241_v60 }
  0xce   :  { %v558_v9 = vpop.eup %557 }
  0xcf   :  { %v560_v10 = vpop.eup %559  ;;  %v149_v11 = vxor.u32 2147483648, %v558_v9 }
  0xd0   :  { %v146_v32 = vxor.u32 2147483648, %v560_v10 }
  0xd1   :  { %v150_v14 = vsel %vm148_vm3, %v149_v11, %v560_v10  ;;  %v357_v16 = vsel %vm355_vm4, %v149_v11, %v560_v10 }
  0xd2   :  { %v147_v18 = vsel %vm145_vm5, %v558_v9, %v146_v32  ;;  %v354_v22 = vsel %vm352_vm6, %v558_v9, %v146_v32 }
  0xd3   :  { %v151_v23 = vsel %vm144_vm7, %v147_v18, %v150_v14  ;;  %v358_v24 = vsel %vm351_vm8, %v354_v22, %v357_v16 }
  0xd4   :  { %v152_v27 = vsel %vm142_vm9, nan, %v151_v23  ;;  %v359_v25 = vsel %vm142_vm9, nan, %v358_v24 }
  0xd5   :  { %v493_v28 = vmul.f32 %v634_v5, %v152_v27  ;;  %v495_v29 = vmul.f32 %v491_v12, %v359_v25 }
  0xd7   :  { %v497_v34 = vadd.f32 %v495_v29, %v493_v28 }
  0xd8   :  { %v562_v35 = vpop.eup %561 }
  0xd9   :  { %499 = vst [vmem:[#allocation2] sm:$0xff] %v497_v34  ;;  %v564_v36 = vpop.eup %563  ;;  %v252_v38 = vxor.u32 2147483648, %v562_v35 }
  0xda   :  { %v249_v40 = vxor.u32 2147483648, %v564_v36 }
  0xdb   :  { %v253_v17 = vsel %vm251_vm10, %v252_v38, %v564_v36  ;;  %v461_v42 = vsel %vm459_vm11, %v252_v38, %v564_v36 }
  0xdc   :  { %v250_v44 = vsel %vm248_vm12, %v562_v35, %v249_v40  ;;  %v458_v5 = vsel %vm456_vm13, %v562_v35, %v249_v40 }
  0xdd   :  { %v254_v46 = vsel %vm247_vm14, %v250_v44, %v253_v17  ;;  %v462_v37 = vsel %vm455_vm15, %v458_v5, %v461_v42 }
  0xde   :  { %v255_v19 = vsel %vm245_vm0, nan, %v254_v46  ;;  %v463_v21 = vsel %vm245_vm0, nan, %v462_v37 }
  0xdf   :  { %v494_v43 = vmul.f32 %v629_v4, %v255_v19  ;;  %v496_v45 = vmul.f32 %v492_v48, %v463_v21 }
  0xe1   :  { %v498_v47 = vadd.f32 %v496_v45, %v494_v43 }
  0xe3   :  { %500 = vst [vmem:[#allocation2 + $0x8] sm:$0xff] %v498_v47 }
  0xe4   :  { %576 = shalt.err (!%p573_p4)
}
  0xe5   :  { %s598_s24 = smov 128   ;;  %s599_s25 = smov 8  }
  0xe6   :  { %512 = dma.vmem_to_hbm [thread:$0]  %s507_s2, 256, %s721_s3, [#allocation3], %s598_s24, %s598_s24, %s599_s25  }
  0xe7   :  { %585 = dma.done.wait [#allocation3], 256  }
  0xe8   :  { %586 = vsyncadd [#allocation3], 4294967040 }
  0xe9   :  { %516 = vsyncpa [#allocation3], 1 }

</bundles_post_ra>
